<compile_context>
chip_gen: v6e
topology: v6e:2x2x1
jax: 0.10.0
libtpu: 0.0.40
codegen_flags: <defaults>
</compile_context>

<pallas_src>
import functools

import jax
import jax.numpy as jnp
import numpy as np
from jax import lax
from jax.experimental import pallas as pl
from jax.experimental.pallas import tpu as pltpu

GAMMA = 0.99
TD_LAMBDA = 0.95
STEP_TYPE_LAST = 2  # alf StepType: FIRST=0, MID=1, LAST=2
LANES = 128
SUBLANES = 8


def _cdiv(a, b):
    return -(-a // b)


def _round_up(x, m):
    return _cdiv(x, m) * m


def _vmem_capacity_bytes():
    """Physical per-core VMEM (used only to size tiles); conservative fallback."""
    try:
        info = pltpu.get_tpu_info()
        for attr in ("vmem_capacity_bytes", "vmem_bytes", "vmem_size_bytes"):
            cap = getattr(info, attr, None)
            if cap:
                return int(cap)
    except Exception:
        pass
    return 64 << 20  # v7x per-TensorCore VMEM: a safe bound on v5e/v6e/v7x


def _choose_tiling(T, rows, budget_bytes):
    """Pick (t_tile, rows_tile).

    Prefer the widest batch tile (multiples of 32 sublanes -> int8 step_type
    and >=4 independent adv FMA chains) that keeps every time step resident in
    the double-buffered VMEM budget; for long horizons fix a wide batch tile
    and tile time instead (reverse-walked 'arbitrary' axis with a VMEM carry).
    """
    # Bytes per (time-row x sublane-row x 128 lanes) over all 7 streamed arrays,
    # double-buffered; conservatively counts step_type as int32.
    row_bytes = 2 * LANES * 7 * 4

    if rows <= SUBLANES:
        # Tiny batch: a single (possibly sub-(8,128)) tile.
        if T * rows * row_bytes <= budget_bytes:
            return T, rows
        return max(2, min(T, budget_bytes // (rows * row_bytes))), rows

    # Widest sublane count that keeps all T rows of every array resident.
    rt = (budget_bytes // (T * row_bytes) // SUBLANES) * SUBLANES
    if rt >= min(rows, 32):
        rt = min(rows, rt, 512)
        if rt >= 32:
            rt = (rt // 32) * 32
        if rows >= 4 * 32:
            # >=4 batch tiles: 2 pipelined tiles per TensorCore on v7x megacore.
            rt = min(rt, max(32, _round_up(_cdiv(rows, 4), 32)))
        return T, rt

    # Long horizon: fix a 32..64-sublane batch tile and tile time instead.
    rt = max(SUBLANES, (min(rows, 64) // SUBLANES) * SUBLANES)
    if rt >= 32:
        rt = (rt // 32) * 32
    t_tile = max(2, min(T, budget_bytes // (rt * row_bytes)))
    return t_tile, rt


def _td_loss_kernel(r_ref, st_ref, d_ref, v_ref, tv_ref,
                    loss_ref, td_ref, carry_ref,
                    *, gamma, td_lambda, t_top, n_tb, unroll):
    """One (batch-tile, time-block) grid step.

    Data refs are blocks of shape (t_tile, S, 128) (step_type int8/int32, rest
    f32).  carry_ref is a (4, S, 128) f32 VMEM scratch holding
    (adv, reward, gamma*discount, target_value) of the global row just above
    this block; it persists across the reverse-walked time grid axis.
    """
    t_tile, S, L = r_ref.shape
    zero = jnp.zeros((S, L), jnp.float32)

    def step(j, carry):
        # carry = (adv, r, gamma*disc, tv) at global time  t0 + j + 1
        adv1, r1, gd1, tv1 = carry
        tv_t = tv_ref[j]
        delta = r1 + gd1 * tv1 - tv_t
        is_last = st_ref[j] == STEP_TYPE_LAST
        adv = jnp.where(is_last, 0.0, delta + (td_lambda * gd1) * adv1)
        td = adv + tv_t - v_ref[j]
        td_ref[j] = td
        loss_ref[j] = td * td
        return adv, r_ref[j], d_ref[j] * gamma, tv_t

    def scan(j_hi, carry):
        """Run `step` for j = j_hi-1 ... 0."""
        if j_hi <= 0:
            return carry
        if j_hi * max(1, S // SUBLANES) <= 32:  # tiny trip count: static unroll
            for j in range(j_hi - 1, -1, -1):
                carry = step(j, carry)
            return carry
        return lax.fori_loop(0, j_hi, lambda i, c: step(j_hi - 1 - i, c),
                             carry, unroll=unroll)

    def top_block():
        # This block holds global row T-1: outputs there are zero-extended and
        # its (reward, gamma*discount, target_value) seed the recursion.
        j_last = t_top - 1
        td_ref[j_last] = zero
        loss_ref[j_last] = zero
        carry = (zero, r_ref[j_last], d_ref[j_last] * gamma, tv_ref[j_last])
        return scan(j_last, carry)

    def save(carry):
        adv1, r1, gd1, tv1 = carry
        carry_ref[0] = adv1
        carry_ref[1] = r1
        carry_ref[2] = gd1
        carry_ref[3] = tv1

    if n_tb == 1:                      # whole horizon resident: no time carry
        top_block()
        return

    k = pl.program_id(1)               # position along the reverse time walk

    @pl.when(k == 0)
    def _():
        save(top_block())

    @pl.when(k != 0)
    def _():
        carry = (carry_ref[0], carry_ref[1], carry_ref[2], carry_ref[3])
        save(scan(t_tile, carry))


def td_loss(reward, step_type, discount, value, target_value,
            gamma=GAMMA, td_lambda=TD_LAMBDA, vmem_budget_bytes=None):
    """Time-major [T, B] inputs. Returns (loss [T, B], td_error [T, B])."""
    T, B = reward.shape
    assert T >= 2, "TDLoss needs at least 2 time steps"

    rows = _cdiv(B, LANES)
    b_pad = rows * LANES

    vmem_cap = _vmem_capacity_bytes()
    if vmem_budget_bytes is None:
        # Per-tile double-buffered working-set target: ~29 MiB on v7x (64 MiB
        # VMEM), ~58 MiB on v5e/v6e (128 MiB) -> big tiles, small per-step cost.
        vmem_budget_bytes = min(int(vmem_cap * 0.45), 64 << 20)
    t_tile, rows_tile = _choose_tiling(T, rows, vmem_budget_bytes)
    n_tb = _cdiv(T, t_tile)
    n_rt = _cdiv(rows, rows_tile)
    t_top = T - (n_tb - 1) * t_tile          # valid rows in the topmost block
    assert t_tile >= 1 and rows_tile >= 1 and 1 <= t_top <= t_tile

    # step_type only feeds a `!= LAST` compare: ship it as int8 whenever the
    # tile allows the native (32, 128) int8 layout (~10% less HBM traffic).
    step_dtype = jnp.int8 if rows_tile % 32 == 0 else jnp.int32

    def prep(x, dtype):
        x = x.astype(dtype)
        if b_pad != B:
            # TODO(synk): lane-unaligned batch pads (extra HBM copy); pass
            # B % 128 == 0 (ideally pre-shaped [T, rows, 128]) for the fast path.
            x = jnp.pad(x, ((0, 0), (0, b_pad - B)))
        return x.reshape(T, rows, LANES)

    r = prep(reward, jnp.float32)
    st = prep(step_type, step_dtype)
    d = prep(discount, jnp.float32)
    v = prep(value, jnp.float32)
    tv = prep(target_value, jnp.float32)

    # Keep adv carry + per-step transients inside the 64-entry vreg file.
    vregs_per_slab = max(1, rows_tile // SUBLANES)
    unroll = max(1, min(8, 48 // (6 * vregs_per_slab)))

    kernel = functools.partial(
        _td_loss_kernel, gamma=float(gamma), td_lambda=float(td_lambda),
        t_top=t_top, n_tb=n_tb, unroll=unroll)

    def idx(i, k):                 # reverse time walk; batch tiles independent
        return (n_tb - 1 - k, i, 0)

    spec = pl.BlockSpec((t_tile, rows_tile, LANES), idx)

    blk = t_tile * rows_tile * LANES
    est = 2 * blk * (6 * 4 + jnp.dtype(step_dtype).itemsize) \
        + 4 * rows_tile * LANES * 4
    vmem_limit = int(min(vmem_cap - (4 << 20), max(est + (8 << 20), 32 << 20)))

    loss, td_error = pl.pallas_call(
        kernel,
        out_shape=(jax.ShapeDtypeStruct((T, rows, LANES), jnp.float32),
                   jax.ShapeDtypeStruct((T, rows, LANES), jnp.float32)),
        grid=(n_rt, n_tb),
        in_specs=[spec, spec, spec, spec, spec],
        out_specs=(spec, spec),
        scratch_shapes=[pltpu.VMEM((4, rows_tile, LANES), jnp.float32)],
        compiler_params=pltpu.CompilerParams(
            dimension_semantics=("parallel", "arbitrary"),
            vmem_limit_bytes=vmem_limit),
    )(r, st, d, v, tv)

    loss = loss.reshape(T, b_pad)[:, :B]
    td_error = td_error.reshape(T, b_pad)[:, :B]
    return loss, td_error


def _td_loss_numpy_ref(reward, step_type, discount, value, target_value,
                       gamma=GAMMA, lam=TD_LAMBDA):
    reward = np.asarray(reward, np.float32)
    step_type = np.asarray(step_type, np.int32)
    discount = np.asarray(discount, np.float32)
    value = np.asarray(value, np.float32)
    target_value = np.asarray(target_value, np.float32)
    T, B = reward.shape
    disc = discount * gamma
    advs = np.zeros((T, B), np.float32)
    for t in reversed(range(T - 1)):
        delta = reward[t + 1] + disc[t + 1] * target_value[t + 1] - target_value[t]
        not_last = (step_type[t] != STEP_TYPE_LAST).astype(np.float32)
        advs[t] = not_last * (delta + disc[t + 1] * lam * advs[t + 1])
    returns = advs[:T - 1] + target_value[:T - 1]
    td = returns - value[:T - 1]
    loss = td * td
    loss = np.concatenate([loss, np.zeros((1, B), np.float32)], axis=0)
    td = np.concatenate([td, np.zeros((1, B), np.float32)], axis=0)
    return loss, td


def _run_case(key, T, B, budget=None):
    k1, k2, k3, k4 = jax.random.split(key, 4)
    reward = jax.random.normal(k1, (T, B), jnp.float32)
    value = jax.random.normal(k2, (T, B), jnp.float32)
    target_value = value + 0.1 * jax.random.normal(k3, (T, B), jnp.float32)
    # Mostly MID steps, ~10% LAST, first row FIRST; zero discount at LAST.
    step_type = jnp.where(jax.random.uniform(k4, (T, B)) < 0.1, 2, 1).astype(
        jnp.int32)
    step_type = step_type.at[0].set(0)
    discount = jnp.where(step_type == STEP_TYPE_LAST, 0.0, 1.0)

    loss, td_error = td_loss(reward, step_type, discount, value, target_value,
                             vmem_budget_bytes=budget)
    jax.block_until_ready((loss, td_error))

    ref_loss, ref_td = _td_loss_numpy_ref(reward, step_type, discount,
                                          value, target_value)
    np.testing.assert_allclose(np.asarray(loss), ref_loss, rtol=1e-5, atol=1e-5)
    np.testing.assert_allclose(np.asarray(td_error), ref_td, rtol=1e-5, atol=1e-5)


if __name__ == "__main__":
    key = jax.random.PRNGKey(0)
    cases = [
        # T,  B,     budget  (None = per-generation default from get_tpu_info)
        (8,   200,   None),      # tiny unaligned batch, static-unroll path
        (40,  1152,  None),      # rows=9 full-dim tile, fori path, int32 step
        (12,  5120,  None),      # 2x32-sublane tiles (one partial), int8 step
        (16,  16384, None),      # 4x32-sublane tiles -> megacore parallel axis
        (37,  8192,  4 << 20),   # forced time tiling + cross-block adv carry
    ]
    for T, B, budget in cases:
        key, sub = jax.random.split(key)
        _run_case(sub, T, B, budget)
    print("KERNEL_OK")
</pallas_src>

<mosaic_0001>
module attributes {stable_mosaic.version = 11 : i64} {
  func.func @_td_loss_kernel(%arg0: i32, %arg1: i32, %arg2: memref<8x2x128xf32, #tpu.memory_space<vmem>>, %arg3: memref<8x2x128xi32, #tpu.memory_space<vmem>>, %arg4: memref<8x2x128xf32, #tpu.memory_space<vmem>>, %arg5: memref<8x2x128xf32, #tpu.memory_space<vmem>>, %arg6: memref<8x2x128xf32, #tpu.memory_space<vmem>>, %arg7: memref<8x2x128xf32, #tpu.memory_space<vmem>>, %arg8: memref<8x2x128xf32, #tpu.memory_space<vmem>>, %arg9: memref<4x2x128xf32, #tpu.memory_space<vmem>>) attributes {dimension_semantics = [#tpu.dimension_semantics<parallel>, #tpu.dimension_semantics<arbitrary>], iteration_bounds = array<i64: 1, 1>, scalar_prefetch = 0 : i64, scratch_operands = 1 : i64, tpu.core_type = #tpu.core_type<tc>, window_params = [{transform_indices = @transform_0, window_bounds = array<i64: 8, 2, 128>}, {transform_indices = @transform_1, window_bounds = array<i64: 8, 2, 128>}, {transform_indices = @transform_2, window_bounds = array<i64: 8, 2, 128>}, {transform_indices = @transform_3, window_bounds = array<i64: 8, 2, 128>}, {transform_indices = @transform_4, window_bounds = array<i64: 8, 2, 128>}, {transform_indices = @transform_5, window_bounds = array<i64: 8, 2, 128>}, {transform_indices = @transform_6, window_bounds = array<i64: 8, 2, 128>}]} {
    %cst = arith.constant 0.000000e+00 : f32
    %0 = vector.broadcast %cst : f32 to vector<2x128xf32>
    %c7 = arith.constant 7 : index
    %c0 = arith.constant 0 : index
    %c0_0 = arith.constant 0 : index
    %1 = vector.load %arg8[%c7, %c0, %c0_0] : memref<8x2x128xf32, #tpu.memory_space<vmem>>, vector<1x2x128xf32>
    %2 = vector.shape_cast %1 : vector<1x2x128xf32> to vector<2x128xf32>
    %3 = vector.shape_cast %0 : vector<2x128xf32> to vector<1x2x128xf32>
    tpu.vector_store %arg8[%c7, %c0, %c0_0], %3 {strides = array<i32>} : memref<8x2x128xf32, #tpu.memory_space<vmem>>, vector<1x2x128xf32>,
    %c7_1 = arith.constant 7 : index
    %c0_2 = arith.constant 0 : index
    %c0_3 = arith.constant 0 : index
    %4 = vector.load %arg7[%c7_1, %c0_2, %c0_3] : memref<8x2x128xf32, #tpu.memory_space<vmem>>, vector<1x2x128xf32>
    %5 = vector.shape_cast %4 : vector<1x2x128xf32> to vector<2x128xf32>
    %6 = vector.shape_cast %0 : vector<2x128xf32> to vector<1x2x128xf32>
    tpu.vector_store %arg7[%c7_1, %c0_2, %c0_3], %6 {strides = array<i32>} : memref<8x2x128xf32, #tpu.memory_space<vmem>>, vector<1x2x128xf32>,
    %c7_4 = arith.constant 7 : index
    %c0_5 = arith.constant 0 : index
    %c0_6 = arith.constant 0 : index
    %7 = vector.load %arg2[%c7_4, %c0_5, %c0_6] : memref<8x2x128xf32, #tpu.memory_space<vmem>>, vector<1x2x128xf32>
    %8 = vector.shape_cast %7 : vector<1x2x128xf32> to vector<2x128xf32>
    %c7_7 = arith.constant 7 : index
    %c0_8 = arith.constant 0 : index
    %c0_9 = arith.constant 0 : index
    %9 = vector.load %arg4[%c7_7, %c0_8, %c0_9] : memref<8x2x128xf32, #tpu.memory_space<vmem>>, vector<1x2x128xf32>
    %10 = vector.shape_cast %9 : vector<1x2x128xf32> to vector<2x128xf32>
    %cst_10 = arith.constant 9.900000e-01 : f32
    %11 = vector.broadcast %cst_10 : f32 to vector<2x128xf32>
    %12 = arith.mulf %10, %11 : vector<2x128xf32>
    %c7_11 = arith.constant 7 : index
    %c0_12 = arith.constant 0 : index
    %c0_13 = arith.constant 0 : index
    %13 = vector.load %arg6[%c7_11, %c0_12, %c0_13] : memref<8x2x128xf32, #tpu.memory_space<vmem>>, vector<1x2x128xf32>
    %14 = vector.shape_cast %13 : vector<1x2x128xf32> to vector<2x128xf32>
    %c6 = arith.constant 6 : index
    %c0_14 = arith.constant 0 : index
    %c0_15 = arith.constant 0 : index
    %15 = vector.load %arg6[%c6, %c0_14, %c0_15] : memref<8x2x128xf32, #tpu.memory_space<vmem>>, vector<1x2x128xf32>
    %16 = vector.shape_cast %15 : vector<1x2x128xf32> to vector<2x128xf32>
    %17 = arith.mulf %12, %14 : vector<2x128xf32>
    %18 = arith.addf %8, %17 : vector<2x128xf32>
    %19 = arith.subf %18, %16 : vector<2x128xf32>
    %c6_16 = arith.constant 6 : index
    %c0_17 = arith.constant 0 : index
    %c0_18 = arith.constant 0 : index
    %20 = vector.load %arg3[%c6_16, %c0_17, %c0_18] : memref<8x2x128xi32, #tpu.memory_space<vmem>>, vector<1x2x128xi32>
    %21 = vector.shape_cast %20 : vector<1x2x128xi32> to vector<2x128xi32>
    %c2_i32 = arith.constant 2 : i32
    %22 = vector.broadcast %c2_i32 : i32 to vector<2x128xi32>
    %23 = arith.cmpi eq, %21, %22 : vector<2x128xi32>
    %cst_19 = arith.constant 0.949999988 : f32
    %24 = vector.broadcast %cst_19 : f32 to vector<2x128xf32>
    %25 = arith.mulf %24, %12 : vector<2x128xf32>
    %26 = arith.mulf %25, %0 : vector<2x128xf32>
    %27 = arith.addf %19, %26 : vector<2x128xf32>
    %cst_20 = arith.constant 0.000000e+00 : f32
    %28 = vector.broadcast %cst_20 : f32 to vector<2x128xf32>
    %29 = arith.select %23, %28, %27 : vector<2x128xi1>, vector<2x128xf32>
    %30 = arith.addf %29, %16 : vector<2x128xf32>
    %c6_21 = arith.constant 6 : index
    %c0_22 = arith.constant 0 : index
    %c0_23 = arith.constant 0 : index
    %31 = vector.load %arg5[%c6_21, %c0_22, %c0_23] : memref<8x2x128xf32, #tpu.memory_space<vmem>>, vector<1x2x128xf32>
    %32 = vector.shape_cast %31 : vector<1x2x128xf32> to vector<2x128xf32>
    %33 = arith.subf %30, %32 : vector<2x128xf32>
    %c6_24 = arith.constant 6 : index
    %c0_25 = arith.constant 0 : index
    %c0_26 = arith.constant 0 : index
    %34 = vector.load %arg8[%c6_24, %c0_25, %c0_26] : memref<8x2x128xf32, #tpu.memory_space<vmem>>, vector<1x2x128xf32>
    %35 = vector.shape_cast %34 : vector<1x2x128xf32> to vector<2x128xf32>
    %36 = vector.shape_cast %33 : vector<2x128xf32> to vector<1x2x128xf32>
    tpu.vector_store %arg8[%c6_24, %c0_25, %c0_26], %36 {strides = array<i32>} : memref<8x2x128xf32, #tpu.memory_space<vmem>>, vector<1x2x128xf32>,
    %37 = arith.mulf %33, %33 : vector<2x128xf32>
    %c6_27 = arith.constant 6 : index
    %c0_28 = arith.constant 0 : index
    %c0_29 = arith.constant 0 : index
    %38 = vector.load %arg7[%c6_27, %c0_28, %c0_29] : memref<8x2x128xf32, #tpu.memory_space<vmem>>, vector<1x2x128xf32>
    %39 = vector.shape_cast %38 : vector<1x2x128xf32> to vector<2x128xf32>
    %40 = vector.shape_cast %37 : vector<2x128xf32> to vector<1x2x128xf32>
    tpu.vector_store %arg7[%c6_27, %c0_28, %c0_29], %40 {strides = array<i32>} : memref<8x2x128xf32, #tpu.memory_space<vmem>>, vector<1x2x128xf32>,
    %c6_30 = arith.constant 6 : index
    %c0_31 = arith.constant 0 : index
    %c0_32 = arith.constant 0 : index
    %41 = vector.load %arg2[%c6_30, %c0_31, %c0_32] : memref<8x2x128xf32, #tpu.memory_space<vmem>>, vector<1x2x128xf32>
    %42 = vector.shape_cast %41 : vector<1x2x128xf32> to vector<2x128xf32>
    %c6_33 = arith.constant 6 : index
    %c0_34 = arith.constant 0 : index
    %c0_35 = arith.constant 0 : index
    %43 = vector.load %arg4[%c6_33, %c0_34, %c0_35] : memref<8x2x128xf32, #tpu.memory_space<vmem>>, vector<1x2x128xf32>
    %44 = vector.shape_cast %43 : vector<1x2x128xf32> to vector<2x128xf32>
    %cst_36 = arith.constant 9.900000e-01 : f32
    %45 = vector.broadcast %cst_36 : f32 to vector<2x128xf32>
    %46 = arith.mulf %44, %45 : vector<2x128xf32>
    %c5 = arith.constant 5 : index
    %c0_37 = arith.constant 0 : index
    %c0_38 = arith.constant 0 : index
    %47 = vector.load %arg6[%c5, %c0_37, %c0_38] : memref<8x2x128xf32, #tpu.memory_space<vmem>>, vector<1x2x128xf32>
    %48 = vector.shape_cast %47 : vector<1x2x128xf32> to vector<2x128xf32>
    %49 = arith.mulf %46, %16 : vector<2x128xf32>
    %50 = arith.addf %42, %49 : vector<2x128xf32>
    %51 = arith.subf %50, %48 : vector<2x128xf32>
    %c5_39 = arith.constant 5 : index
    %c0_40 = arith.constant 0 : index
    %c0_41 = arith.constant 0 : index
    %52 = vector.load %arg3[%c5_39, %c0_40, %c0_41] : memref<8x2x128xi32, #tpu.memory_space<vmem>>, vector<1x2x128xi32>
    %53 = vector.shape_cast %52 : vector<1x2x128xi32> to vector<2x128xi32>
    %c2_i32_42 = arith.constant 2 : i32
    %54 = vector.broadcast %c2_i32_42 : i32 to vector<2x128xi32>
    %55 = arith.cmpi eq, %53, %54 : vector<2x128xi32>
    %cst_43 = arith.constant 0.949999988 : f32
    %56 = vector.broadcast %cst_43 : f32 to vector<2x128xf32>
    %57 = arith.mulf %56, %46 : vector<2x128xf32>
    %58 = arith.mulf %57, %29 : vector<2x128xf32>
    %59 = arith.addf %51, %58 : vector<2x128xf32>
    %cst_44 = arith.constant 0.000000e+00 : f32
    %60 = vector.broadcast %cst_44 : f32 to vector<2x128xf32>
    %61 = arith.select %55, %60, %59 : vector<2x128xi1>, vector<2x128xf32>
    %62 = arith.addf %61, %48 : vector<2x128xf32>
    %c5_45 = arith.constant 5 : index
    %c0_46 = arith.constant 0 : index
    %c0_47 = arith.constant 0 : index
    %63 = vector.load %arg5[%c5_45, %c0_46, %c0_47] : memref<8x2x128xf32, #tpu.memory_space<vmem>>, vector<1x2x128xf32>
    %64 = vector.shape_cast %63 : vector<1x2x128xf32> to vector<2x128xf32>
    %65 = arith.subf %62, %64 : vector<2x128xf32>
    %c5_48 = arith.constant 5 : index
    %c0_49 = arith.constant 0 : index
    %c0_50 = arith.constant 0 : index
    %66 = vector.load %arg8[%c5_48, %c0_49, %c0_50] : memref<8x2x128xf32, #tpu.memory_space<vmem>>, vector<1x2x128xf32>
    %67 = vector.shape_cast %66 : vector<1x2x128xf32> to vector<2x128xf32>
    %68 = vector.shape_cast %65 : vector<2x128xf32> to vector<1x2x128xf32>
    tpu.vector_store %arg8[%c5_48, %c0_49, %c0_50], %68 {strides = array<i32>} : memref<8x2x128xf32, #tpu.memory_space<vmem>>, vector<1x2x128xf32>,
    %69 = arith.mulf %65, %65 : vector<2x128xf32>
    %c5_51 = arith.constant 5 : index
    %c0_52 = arith.constant 0 : index
    %c0_53 = arith.constant 0 : index
    %70 = vector.load %arg7[%c5_51, %c0_52, %c0_53] : memref<8x2x128xf32, #tpu.memory_space<vmem>>, vector<1x2x128xf32>
    %71 = vector.shape_cast %70 : vector<1x2x128xf32> to vector<2x128xf32>
    %72 = vector.shape_cast %69 : vector<2x128xf32> to vector<1x2x128xf32>
    tpu.vector_store %arg7[%c5_51, %c0_52, %c0_53], %72 {strides = array<i32>} : memref<8x2x128xf32, #tpu.memory_space<vmem>>, vector<1x2x128xf32>,
    %c5_54 = arith.constant 5 : index
    %c0_55 = arith.constant 0 : index
    %c0_56 = arith.constant 0 : index
    %73 = vector.load %arg2[%c5_54, %c0_55, %c0_56] : memref<8x2x128xf32, #tpu.memory_space<vmem>>, vector<1x2x128xf32>
    %74 = vector.shape_cast %73 : vector<1x2x128xf32> to vector<2x128xf32>
    %c5_57 = arith.constant 5 : index
    %c0_58 = arith.constant 0 : index
    %c0_59 = arith.constant 0 : index
    %75 = vector.load %arg4[%c5_57, %c0_58, %c0_59] : memref<8x2x128xf32, #tpu.memory_space<vmem>>, vector<1x2x128xf32>
    %76 = vector.shape_cast %75 : vector<1x2x128xf32> to vector<2x128xf32>
    %cst_60 = arith.constant 9.900000e-01 : f32
    %77 = vector.broadcast %cst_60 : f32 to vector<2x128xf32>
    %78 = arith.mulf %76, %77 : vector<2x128xf32>
    %c4 = arith.constant 4 : index
    %c0_61 = arith.constant 0 : index
    %c0_62 = arith.constant 0 : index
    %79 = vector.load %arg6[%c4, %c0_61, %c0_62] : memref<8x2x128xf32, #tpu.memory_space<vmem>>, vector<1x2x128xf32>
    %80 = vector.shape_cast %79 : vector<1x2x128xf32> to vector<2x128xf32>
    %81 = arith.mulf %78, %48 : vector<2x128xf32>
    %82 = arith.addf %74, %81 : vector<2x128xf32>
    %83 = arith.subf %82, %80 : vector<2x128xf32>
    %c4_63 = arith.constant 4 : index
    %c0_64 = arith.constant 0 : index
    %c0_65 = arith.constant 0 : index
    %84 = vector.load %arg3[%c4_63, %c0_64, %c0_65] : memref<8x2x128xi32, #tpu.memory_space<vmem>>, vector<1x2x128xi32>
    %85 = vector.shape_cast %84 : vector<1x2x128xi32> to vector<2x128xi32>
    %c2_i32_66 = arith.constant 2 : i32
    %86 = vector.broadcast %c2_i32_66 : i32 to vector<2x128xi32>
    %87 = arith.cmpi eq, %85, %86 : vector<2x128xi32>
    %cst_67 = arith.constant 0.949999988 : f32
    %88 = vector.broadcast %cst_67 : f32 to vector<2x128xf32>
    %89 = arith.mulf %88, %78 : vector<2x128xf32>
    %90 = arith.mulf %89, %61 : vector<2x128xf32>
    %91 = arith.addf %83, %90 : vector<2x128xf32>
    %cst_68 = arith.constant 0.000000e+00 : f32
    %92 = vector.broadcast %cst_68 : f32 to vector<2x128xf32>
    %93 = arith.select %87, %92, %91 : vector<2x128xi1>, vector<2x128xf32>
    %94 = arith.addf %93, %80 : vector<2x128xf32>
    %c4_69 = arith.constant 4 : index
    %c0_70 = arith.constant 0 : index
    %c0_71 = arith.constant 0 : index
    %95 = vector.load %arg5[%c4_69, %c0_70, %c0_71] : memref<8x2x128xf32, #tpu.memory_space<vmem>>, vector<1x2x128xf32>
    %96 = vector.shape_cast %95 : vector<1x2x128xf32> to vector<2x128xf32>
    %97 = arith.subf %94, %96 : vector<2x128xf32>
    %c4_72 = arith.constant 4 : index
    %c0_73 = arith.constant 0 : index
    %c0_74 = arith.constant 0 : index
    %98 = vector.load %arg8[%c4_72, %c0_73, %c0_74] : memref<8x2x128xf32, #tpu.memory_space<vmem>>, vector<1x2x128xf32>
    %99 = vector.shape_cast %98 : vector<1x2x128xf32> to vector<2x128xf32>
    %100 = vector.shape_cast %97 : vector<2x128xf32> to vector<1x2x128xf32>
    tpu.vector_store %arg8[%c4_72, %c0_73, %c0_74], %100 {strides = array<i32>} : memref<8x2x128xf32, #tpu.memory_space<vmem>>, vector<1x2x128xf32>,
    %101 = arith.mulf %97, %97 : vector<2x128xf32>
    %c4_75 = arith.constant 4 : index
    %c0_76 = arith.constant 0 : index
    %c0_77 = arith.constant 0 : index
    %102 = vector.load %arg7[%c4_75, %c0_76, %c0_77] : memref<8x2x128xf32, #tpu.memory_space<vmem>>, vector<1x2x128xf32>
    %103 = vector.shape_cast %102 : vector<1x2x128xf32> to vector<2x128xf32>
    %104 = vector.shape_cast %101 : vector<2x128xf32> to vector<1x2x128xf32>
    tpu.vector_store %arg7[%c4_75, %c0_76, %c0_77], %104 {strides = array<i32>} : memref<8x2x128xf32, #tpu.memory_space<vmem>>, vector<1x2x128xf32>,
    %c4_78 = arith.constant 4 : index
    %c0_79 = arith.constant 0 : index
    %c0_80 = arith.constant 0 : index
    %105 = vector.load %arg2[%c4_78, %c0_79, %c0_80] : memref<8x2x128xf32, #tpu.memory_space<vmem>>, vector<1x2x128xf32>
    %106 = vector.shape_cast %105 : vector<1x2x128xf32> to vector<2x128xf32>
    %c4_81 = arith.constant 4 : index
    %c0_82 = arith.constant 0 : index
    %c0_83 = arith.constant 0 : index
    %107 = vector.load %arg4[%c4_81, %c0_82, %c0_83] : memref<8x2x128xf32, #tpu.memory_space<vmem>>, vector<1x2x128xf32>
    %108 = vector.shape_cast %107 : vector<1x2x128xf32> to vector<2x128xf32>
    %cst_84 = arith.constant 9.900000e-01 : f32
    %109 = vector.broadcast %cst_84 : f32 to vector<2x128xf32>
    %110 = arith.mulf %108, %109 : vector<2x128xf32>
    %c3 = arith.constant 3 : index
    %c0_85 = arith.constant 0 : index
    %c0_86 = arith.constant 0 : index
    %111 = vector.load %arg6[%c3, %c0_85, %c0_86] : memref<8x2x128xf32, #tpu.memory_space<vmem>>, vector<1x2x128xf32>
    %112 = vector.shape_cast %111 : vector<1x2x128xf32> to vector<2x128xf32>
    %113 = arith.mulf %110, %80 : vector<2x128xf32>
    %114 = arith.addf %106, %113 : vector<2x128xf32>
    %115 = arith.subf %114, %112 : vector<2x128xf32>
    %c3_87 = arith.constant 3 : index
    %c0_88 = arith.constant 0 : index
    %c0_89 = arith.constant 0 : index
    %116 = vector.load %arg3[%c3_87, %c0_88, %c0_89] : memref<8x2x128xi32, #tpu.memory_space<vmem>>, vector<1x2x128xi32>
    %117 = vector.shape_cast %116 : vector<1x2x128xi32> to vector<2x128xi32>
    %c2_i32_90 = arith.constant 2 : i32
    %118 = vector.broadcast %c2_i32_90 : i32 to vector<2x128xi32>
    %119 = arith.cmpi eq, %117, %118 : vector<2x128xi32>
    %cst_91 = arith.constant 0.949999988 : f32
    %120 = vector.broadcast %cst_91 : f32 to vector<2x128xf32>
    %121 = arith.mulf %120, %110 : vector<2x128xf32>
    %122 = arith.mulf %121, %93 : vector<2x128xf32>
    %123 = arith.addf %115, %122 : vector<2x128xf32>
    %cst_92 = arith.constant 0.000000e+00 : f32
    %124 = vector.broadcast %cst_92 : f32 to vector<2x128xf32>
    %125 = arith.select %119, %124, %123 : vector<2x128xi1>, vector<2x128xf32>
    %126 = arith.addf %125, %112 : vector<2x128xf32>
    %c3_93 = arith.constant 3 : index
    %c0_94 = arith.constant 0 : index
    %c0_95 = arith.constant 0 : index
    %127 = vector.load %arg5[%c3_93, %c0_94, %c0_95] : memref<8x2x128xf32, #tpu.memory_space<vmem>>, vector<1x2x128xf32>
    %128 = vector.shape_cast %127 : vector<1x2x128xf32> to vector<2x128xf32>
    %129 = arith.subf %126, %128 : vector<2x128xf32>
    %c3_96 = arith.constant 3 : index
    %c0_97 = arith.constant 0 : index
    %c0_98 = arith.constant 0 : index
    %130 = vector.load %arg8[%c3_96, %c0_97, %c0_98] : memref<8x2x128xf32, #tpu.memory_space<vmem>>, vector<1x2x128xf32>
    %131 = vector.shape_cast %130 : vector<1x2x128xf32> to vector<2x128xf32>
    %132 = vector.shape_cast %129 : vector<2x128xf32> to vector<1x2x128xf32>
    tpu.vector_store %arg8[%c3_96, %c0_97, %c0_98], %132 {strides = array<i32>} : memref<8x2x128xf32, #tpu.memory_space<vmem>>, vector<1x2x128xf32>,
    %133 = arith.mulf %129, %129 : vector<2x128xf32>
    %c3_99 = arith.constant 3 : index
    %c0_100 = arith.constant 0 : index
    %c0_101 = arith.constant 0 : index
    %134 = vector.load %arg7[%c3_99, %c0_100, %c0_101] : memref<8x2x128xf32, #tpu.memory_space<vmem>>, vector<1x2x128xf32>
    %135 = vector.shape_cast %134 : vector<1x2x128xf32> to vector<2x128xf32>
    %136 = vector.shape_cast %133 : vector<2x128xf32> to vector<1x2x128xf32>
    tpu.vector_store %arg7[%c3_99, %c0_100, %c0_101], %136 {strides = array<i32>} : memref<8x2x128xf32, #tpu.memory_space<vmem>>, vector<1x2x128xf32>,
    %c3_102 = arith.constant 3 : index
    %c0_103 = arith.constant 0 : index
    %c0_104 = arith.constant 0 : index
    %137 = vector.load %arg2[%c3_102, %c0_103, %c0_104] : memref<8x2x128xf32, #tpu.memory_space<vmem>>, vector<1x2x128xf32>
    %138 = vector.shape_cast %137 : vector<1x2x128xf32> to vector<2x128xf32>
    %c3_105 = arith.constant 3 : index
    %c0_106 = arith.constant 0 : index
    %c0_107 = arith.constant 0 : index
    %139 = vector.load %arg4[%c3_105, %c0_106, %c0_107] : memref<8x2x128xf32, #tpu.memory_space<vmem>>, vector<1x2x128xf32>
    %140 = vector.shape_cast %139 : vector<1x2x128xf32> to vector<2x128xf32>
    %cst_108 = arith.constant 9.900000e-01 : f32
    %141 = vector.broadcast %cst_108 : f32 to vector<2x128xf32>
    %142 = arith.mulf %140, %141 : vector<2x128xf32>
    %c2 = arith.constant 2 : index
    %c0_109 = arith.constant 0 : index
    %c0_110 = arith.constant 0 : index
    %143 = vector.load %arg6[%c2, %c0_109, %c0_110] : memref<8x2x128xf32, #tpu.memory_space<vmem>>, vector<1x2x128xf32>
    %144 = vector.shape_cast %143 : vector<1x2x128xf32> to vector<2x128xf32>
    %145 = arith.mulf %142, %112 : vector<2x128xf32>
    %146 = arith.addf %138, %145 : vector<2x128xf32>
    %147 = arith.subf %146, %144 : vector<2x128xf32>
    %c2_111 = arith.constant 2 : index
    %c0_112 = arith.constant 0 : index
    %c0_113 = arith.constant 0 : index
    %148 = vector.load %arg3[%c2_111, %c0_112, %c0_113] : memref<8x2x128xi32, #tpu.memory_space<vmem>>, vector<1x2x128xi32>
    %149 = vector.shape_cast %148 : vector<1x2x128xi32> to vector<2x128xi32>
    %c2_i32_114 = arith.constant 2 : i32
    %150 = vector.broadcast %c2_i32_114 : i32 to vector<2x128xi32>
    %151 = arith.cmpi eq, %149, %150 : vector<2x128xi32>
    %cst_115 = arith.constant 0.949999988 : f32
    %152 = vector.broadcast %cst_115 : f32 to vector<2x128xf32>
    %153 = arith.mulf %152, %142 : vector<2x128xf32>
    %154 = arith.mulf %153, %125 : vector<2x128xf32>
    %155 = arith.addf %147, %154 : vector<2x128xf32>
    %cst_116 = arith.constant 0.000000e+00 : f32
    %156 = vector.broadcast %cst_116 : f32 to vector<2x128xf32>
    %157 = arith.select %151, %156, %155 : vector<2x128xi1>, vector<2x128xf32>
    %158 = arith.addf %157, %144 : vector<2x128xf32>
    %c2_117 = arith.constant 2 : index
    %c0_118 = arith.constant 0 : index
    %c0_119 = arith.constant 0 : index
    %159 = vector.load %arg5[%c2_117, %c0_118, %c0_119] : memref<8x2x128xf32, #tpu.memory_space<vmem>>, vector<1x2x128xf32>
    %160 = vector.shape_cast %159 : vector<1x2x128xf32> to vector<2x128xf32>
    %161 = arith.subf %158, %160 : vector<2x128xf32>
    %c2_120 = arith.constant 2 : index
    %c0_121 = arith.constant 0 : index
    %c0_122 = arith.constant 0 : index
    %162 = vector.load %arg8[%c2_120, %c0_121, %c0_122] : memref<8x2x128xf32, #tpu.memory_space<vmem>>, vector<1x2x128xf32>
    %163 = vector.shape_cast %162 : vector<1x2x128xf32> to vector<2x128xf32>
    %164 = vector.shape_cast %161 : vector<2x128xf32> to vector<1x2x128xf32>
    tpu.vector_store %arg8[%c2_120, %c0_121, %c0_122], %164 {strides = array<i32>} : memref<8x2x128xf32, #tpu.memory_space<vmem>>, vector<1x2x128xf32>,
    %165 = arith.mulf %161, %161 : vector<2x128xf32>
    %c2_123 = arith.constant 2 : index
    %c0_124 = arith.constant 0 : index
    %c0_125 = arith.constant 0 : index
    %166 = vector.load %arg7[%c2_123, %c0_124, %c0_125] : memref<8x2x128xf32, #tpu.memory_space<vmem>>, vector<1x2x128xf32>
    %167 = vector.shape_cast %166 : vector<1x2x128xf32> to vector<2x128xf32>
    %168 = vector.shape_cast %165 : vector<2x128xf32> to vector<1x2x128xf32>
    tpu.vector_store %arg7[%c2_123, %c0_124, %c0_125], %168 {strides = array<i32>} : memref<8x2x128xf32, #tpu.memory_space<vmem>>, vector<1x2x128xf32>,
    %c2_126 = arith.constant 2 : index
    %c0_127 = arith.constant 0 : index
    %c0_128 = arith.constant 0 : index
    %169 = vector.load %arg2[%c2_126, %c0_127, %c0_128] : memref<8x2x128xf32, #tpu.memory_space<vmem>>, vector<1x2x128xf32>
    %170 = vector.shape_cast %169 : vector<1x2x128xf32> to vector<2x128xf32>
    %c2_129 = arith.constant 2 : index
    %c0_130 = arith.constant 0 : index
    %c0_131 = arith.constant 0 : index
    %171 = vector.load %arg4[%c2_129, %c0_130, %c0_131] : memref<8x2x128xf32, #tpu.memory_space<vmem>>, vector<1x2x128xf32>
    %172 = vector.shape_cast %171 : vector<1x2x128xf32> to vector<2x128xf32>
    %cst_132 = arith.constant 9.900000e-01 : f32
    %173 = vector.broadcast %cst_132 : f32 to vector<2x128xf32>
    %174 = arith.mulf %172, %173 : vector<2x128xf32>
    %c1 = arith.constant 1 : index
    %c0_133 = arith.constant 0 : index
    %c0_134 = arith.constant 0 : index
    %175 = vector.load %arg6[%c1, %c0_133, %c0_134] : memref<8x2x128xf32, #tpu.memory_space<vmem>>, vector<1x2x128xf32>
    %176 = vector.shape_cast %175 : vector<1x2x128xf32> to vector<2x128xf32>
    %177 = arith.mulf %174, %144 : vector<2x128xf32>
    %178 = arith.addf %170, %177 : vector<2x128xf32>
    %179 = arith.subf %178, %176 : vector<2x128xf32>
    %c1_135 = arith.constant 1 : index
    %c0_136 = arith.constant 0 : index
    %c0_137 = arith.constant 0 : index
    %180 = vector.load %arg3[%c1_135, %c0_136, %c0_137] : memref<8x2x128xi32, #tpu.memory_space<vmem>>, vector<1x2x128xi32>
    %181 = vector.shape_cast %180 : vector<1x2x128xi32> to vector<2x128xi32>
    %c2_i32_138 = arith.constant 2 : i32
    %182 = vector.broadcast %c2_i32_138 : i32 to vector<2x128xi32>
    %183 = arith.cmpi eq, %181, %182 : vector<2x128xi32>
    %cst_139 = arith.constant 0.949999988 : f32
    %184 = vector.broadcast %cst_139 : f32 to vector<2x128xf32>
    %185 = arith.mulf %184, %174 : vector<2x128xf32>
    %186 = arith.mulf %185, %157 : vector<2x128xf32>
    %187 = arith.addf %179, %186 : vector<2x128xf32>
    %cst_140 = arith.constant 0.000000e+00 : f32
    %188 = vector.broadcast %cst_140 : f32 to vector<2x128xf32>
    %189 = arith.select %183, %188, %187 : vector<2x128xi1>, vector<2x128xf32>
    %190 = arith.addf %189, %176 : vector<2x128xf32>
    %c1_141 = arith.constant 1 : index
    %c0_142 = arith.constant 0 : index
    %c0_143 = arith.constant 0 : index
    %191 = vector.load %arg5[%c1_141, %c0_142, %c0_143] : memref<8x2x128xf32, #tpu.memory_space<vmem>>, vector<1x2x128xf32>
    %192 = vector.shape_cast %191 : vector<1x2x128xf32> to vector<2x128xf32>
    %193 = arith.subf %190, %192 : vector<2x128xf32>
    %c1_144 = arith.constant 1 : index
    %c0_145 = arith.constant 0 : index
    %c0_146 = arith.constant 0 : index
    %194 = vector.load %arg8[%c1_144, %c0_145, %c0_146] : memref<8x2x128xf32, #tpu.memory_space<vmem>>, vector<1x2x128xf32>
    %195 = vector.shape_cast %194 : vector<1x2x128xf32> to vector<2x128xf32>
    %196 = vector.shape_cast %193 : vector<2x128xf32> to vector<1x2x128xf32>
    tpu.vector_store %arg8[%c1_144, %c0_145, %c0_146], %196 {strides = array<i32>} : memref<8x2x128xf32, #tpu.memory_space<vmem>>, vector<1x2x128xf32>,
    %197 = arith.mulf %193, %193 : vector<2x128xf32>
    %c1_147 = arith.constant 1 : index
    %c0_148 = arith.constant 0 : index
    %c0_149 = arith.constant 0 : index
    %198 = vector.load %arg7[%c1_147, %c0_148, %c0_149] : memref<8x2x128xf32, #tpu.memory_space<vmem>>, vector<1x2x128xf32>
    %199 = vector.shape_cast %198 : vector<1x2x128xf32> to vector<2x128xf32>
    %200 = vector.shape_cast %197 : vector<2x128xf32> to vector<1x2x128xf32>
    tpu.vector_store %arg7[%c1_147, %c0_148, %c0_149], %200 {strides = array<i32>} : memref<8x2x128xf32, #tpu.memory_space<vmem>>, vector<1x2x128xf32>,
    %c1_150 = arith.constant 1 : index
    %c0_151 = arith.constant 0 : index
    %c0_152 = arith.constant 0 : index
    %201 = vector.load %arg2[%c1_150, %c0_151, %c0_152] : memref<8x2x128xf32, #tpu.memory_space<vmem>>, vector<1x2x128xf32>
    %202 = vector.shape_cast %201 : vector<1x2x128xf32> to vector<2x128xf32>
    %c1_153 = arith.constant 1 : index
    %c0_154 = arith.constant 0 : index
    %c0_155 = arith.constant 0 : index
    %203 = vector.load %arg4[%c1_153, %c0_154, %c0_155] : memref<8x2x128xf32, #tpu.memory_space<vmem>>, vector<1x2x128xf32>
    %204 = vector.shape_cast %203 : vector<1x2x128xf32> to vector<2x128xf32>
    %cst_156 = arith.constant 9.900000e-01 : f32
    %205 = vector.broadcast %cst_156 : f32 to vector<2x128xf32>
    %206 = arith.mulf %204, %205 : vector<2x128xf32>
    %c0_157 = arith.constant 0 : index
    %c0_158 = arith.constant 0 : index
    %c0_159 = arith.constant 0 : index
    %207 = vector.load %arg6[%c0_157, %c0_158, %c0_159] : memref<8x2x128xf32, #tpu.memory_space<vmem>>, vector<1x2x128xf32>
    %208 = vector.shape_cast %207 : vector<1x2x128xf32> to vector<2x128xf32>
    %209 = arith.mulf %206, %176 : vector<2x128xf32>
    %210 = arith.addf %202, %209 : vector<2x128xf32>
    %211 = arith.subf %210, %208 : vector<2x128xf32>
    %c0_160 = arith.constant 0 : index
    %c0_161 = arith.constant 0 : index
    %c0_162 = arith.constant 0 : index
    %212 = vector.load %arg3[%c0_160, %c0_161, %c0_162] : memref<8x2x128xi32, #tpu.memory_space<vmem>>, vector<1x2x128xi32>
    %213 = vector.shape_cast %212 : vector<1x2x128xi32> to vector<2x128xi32>
    %c2_i32_163 = arith.constant 2 : i32
    %214 = vector.broadcast %c2_i32_163 : i32 to vector<2x128xi32>
    %215 = arith.cmpi eq, %213, %214 : vector<2x128xi32>
    %cst_164 = arith.constant 0.949999988 : f32
    %216 = vector.broadcast %cst_164 : f32 to vector<2x128xf32>
    %217 = arith.mulf %216, %206 : vector<2x128xf32>
    %218 = arith.mulf %217, %189 : vector<2x128xf32>
    %219 = arith.addf %211, %218 : vector<2x128xf32>
    %cst_165 = arith.constant 0.000000e+00 : f32
    %220 = vector.broadcast %cst_165 : f32 to vector<2x128xf32>
    %221 = arith.select %215, %220, %219 : vector<2x128xi1>, vector<2x128xf32>
    %222 = arith.addf %221, %208 : vector<2x128xf32>
    %c0_166 = arith.constant 0 : index
    %c0_167 = arith.constant 0 : index
    %c0_168 = arith.constant 0 : index
    %223 = vector.load %arg5[%c0_166, %c0_167, %c0_168] : memref<8x2x128xf32, #tpu.memory_space<vmem>>, vector<1x2x128xf32>
    %224 = vector.shape_cast %223 : vector<1x2x128xf32> to vector<2x128xf32>
    %225 = arith.subf %222, %224 : vector<2x128xf32>
    %c0_169 = arith.constant 0 : index
    %c0_170 = arith.constant 0 : index
    %c0_171 = arith.constant 0 : index
    %226 = vector.load %arg8[%c0_169, %c0_170, %c0_171] : memref<8x2x128xf32, #tpu.memory_space<vmem>>, vector<1x2x128xf32>
    %227 = vector.shape_cast %226 : vector<1x2x128xf32> to vector<2x128xf32>
    %228 = vector.shape_cast %225 : vector<2x128xf32> to vector<1x2x128xf32>
    tpu.vector_store %arg8[%c0_169, %c0_170, %c0_171], %228 {strides = array<i32>} : memref<8x2x128xf32, #tpu.memory_space<vmem>>, vector<1x2x128xf32>,
    %229 = arith.mulf %225, %225 : vector<2x128xf32>
    %c0_172 = arith.constant 0 : index
    %c0_173 = arith.constant 0 : index
    %c0_174 = arith.constant 0 : index
    %230 = vector.load %arg7[%c0_172, %c0_173, %c0_174] : memref<8x2x128xf32, #tpu.memory_space<vmem>>, vector<1x2x128xf32>
    %231 = vector.shape_cast %230 : vector<1x2x128xf32> to vector<2x128xf32>
    %232 = vector.shape_cast %229 : vector<2x128xf32> to vector<1x2x128xf32>
    tpu.vector_store %arg7[%c0_172, %c0_173, %c0_174], %232 {strides = array<i32>} : memref<8x2x128xf32, #tpu.memory_space<vmem>>, vector<1x2x128xf32>,
    return
  }
  func.func @transform_0(%arg0: i32, %arg1: i32) -> (i32, i32, i32) {
    %c0_i32 = arith.constant 0 : i32
    %0 = arith.subi %c0_i32, %arg1 : i32
    %c0_i32_0 = arith.constant 0 : i32
    %c0_i32_1 = arith.constant 0 : i32
    return %0, %arg0, %c0_i32_0 : i32, i32, i32
  }
  func.func @transform_1(%arg0: i32, %arg1: i32) -> (i32, i32, i32) {
    %c0_i32 = arith.constant 0 : i32
    %0 = arith.subi %c0_i32, %arg1 : i32
    %c0_i32_0 = arith.constant 0 : i32
    %c0_i32_1 = arith.constant 0 : i32
    return %0, %arg0, %c0_i32_0 : i32, i32, i32
  }
  func.func @transform_2(%arg0: i32, %arg1: i32) -> (i32, i32, i32) {
    %c0_i32 = arith.constant 0 : i32
    %0 = arith.subi %c0_i32, %arg1 : i32
    %c0_i32_0 = arith.constant 0 : i32
    %c0_i32_1 = arith.constant 0 : i32
    return %0, %arg0, %c0_i32_0 : i32, i32, i32
  }
  func.func @transform_3(%arg0: i32, %arg1: i32) -> (i32, i32, i32) {
    %c0_i32 = arith.constant 0 : i32
    %0 = arith.subi %c0_i32, %arg1 : i32
    %c0_i32_0 = arith.constant 0 : i32
    %c0_i32_1 = arith.constant 0 : i32
    return %0, %arg0, %c0_i32_0 : i32, i32, i32
  }
  func.func @transform_4(%arg0: i32, %arg1: i32) -> (i32, i32, i32) {
    %c0_i32 = arith.constant 0 : i32
    %0 = arith.subi %c0_i32, %arg1 : i32
    %c0_i32_0 = arith.constant 0 : i32
    %c0_i32_1 = arith.constant 0 : i32
    return %0, %arg0, %c0_i32_0 : i32, i32, i32
  }
  func.func @transform_5(%arg0: i32, %arg1: i32) -> (i32, i32, i32) {
    %c0_i32 = arith.constant 0 : i32
    %0 = arith.subi %c0_i32, %arg1 : i32
    %c0_i32_0 = arith.constant 0 : i32
    %c0_i32_1 = arith.constant 0 : i32
    return %0, %arg0, %c0_i32_0 : i32, i32, i32
  }
  func.func @transform_6(%arg0: i32, %arg1: i32) -> (i32, i32, i32) {
    %c0_i32 = arith.constant 0 : i32
    %0 = arith.subi %c0_i32, %arg1 : i32
    %c0_i32_0 = arith.constant 0 : i32
    %c0_i32_1 = arith.constant 0 : i32
    return %0, %arg0, %c0_i32_0 : i32, i32, i32
  }
}

</mosaic_0001>

<bundles_post_ra>
// kernel: tpu_custom_call.1
= control target key start
LH: loop header
LB: loop body
LE: loop exit
PB: predicated region body
PF: predicated region fallthrough
CT: control target
= control target key end

     0   :  { %12 = vsyncpa [#allocation4], 0  ;;  %s613_s0 = inlined_call_operand.hbm [shape: f32[8,2,128], index: 0, kind: input, shape index: {}]   ;;  %s614_s1 = inlined_call_operand.hbm [shape: s32[8,2,128], index: 1, kind: input, shape index: {}]   ;;  %s615_s2 = inlined_call_operand.hbm [shape: f32[8,2,128], index: 2, kind: input, shape index: {}]   ;;  %s616_s3 = inlined_call_operand.hbm [shape: f32[8,2,128], index: 3, kind: input, shape index: {}]   ;;  %s617_s4 = inlined_call_operand.hbm [shape: f32[8,2,128], index: 4, kind: input, shape index: {}]   ;;  %s618_s5 = inlined_call_operand.hbm [shape: f32[8,2,128], index: 5, kind: output, shape index: {0}]   ;;  %s619_s6 = inlined_call_operand.hbm [shape: f32[8,2,128], index: 6, kind: output, shape index: {1}]  }
   0x1   :  { %13 = vsyncpa [#allocation7], 0 }
   0x2   :  { %14 = vsyncpa [#allocation10], 0 }
   0x3   :  { %15 = vsyncpa [#allocation5], 0 }
   0x4   :  { %16 = vsyncpa [#allocation14], 0  ;;  %s526_s21 = smov [#allocation6]   ;;  %s527_s23 = smov [#allocation9]  }
   0x5   :  { %s42_s22 = sshll.u32 %s526_s21, 4  ;;  %s74_s24 = sshll.u32 %s527_s23, 4  ;;  %s43_s22 = int_to_ptr.vmem [resolvable:$true] %s42_s22  ;;  %s75_s24 = int_to_ptr.vmem [resolvable:$true] %s74_s24 }
   0x6   :  { %s384_s25 = scalar_lea.vmem %s43_s22, 256  ;;  %p389_p1 = scmp.lt.s32.totalorder %s43_s22, %s43_s22 }
   0x7   :  { %p385_p0 = scmp.ne.s32.totalorder %s43_s22, %s384_s25  ;;  %p390_p2 = scmp.lt.s32.totalorder %s384_s25, %s384_s25 }
   0x9   :  { %p391_p3 = por %p390_p2, %p389_p1 }
   0xb   :  { %p392_p4 = pnand %p391_p3, %p385_p0 }
   0xd   :  { %395 = shalt.err (!%p392_p4)
}
   0xe   :  { %s528_s26 = smov 32   ;;  %s529_s27 = smov 2  }
   0xf   :  { %48 = dma.hbm_to_vmem [thread:$0]  %s614_s1, 256, %s43_s22, [#allocation7], %s528_s26, %s528_s26, %s529_s27  }
  0x10   :  { %s404_s30 = scalar_lea.vmem %s75_s24, 256  ;;  %p409_p6 = scmp.lt.s32.totalorder %s75_s24, %s75_s24 }
  0x11   :  { %p405_p5 = scmp.ne.s32.totalorder %s75_s24, %s404_s30  ;;  %p410_p7 = scmp.lt.s32.totalorder %s404_s30, %s404_s30 }
  0x13   :  { %p411_p8 = por %p410_p7, %p409_p6 }
  0x15   :  { %p412_p9 = pnand %p411_p8, %p405_p5 }
  0x17   :  { %415 = shalt.err (!%p412_p9)
}
  0x18   :  { %80 = dma.hbm_to_vmem [thread:$0]  %s616_s3, 256, %s75_s24, [#allocation10], %s528_s26, %s528_s26, %s529_s27  }
  0x19   :  { %s530_s9 = smov [#allocation3]   ;;  %s531_s11 = smov [#allocation8]  }
  0x1a   :  { %s26_s10 = sshll.u32 %s530_s9, 4  ;;  %s58_s12 = sshll.u32 %s531_s11, 4  ;;  %s27_s10 = int_to_ptr.vmem [resolvable:$true] %s26_s10  ;;  %s59_s12 = int_to_ptr.vmem [resolvable:$true] %s58_s12 }
  0x1b   :  { %s424_s1 = scalar_lea.vmem %s27_s10, 256  ;;  %p429_p11 = scmp.lt.s32.totalorder %s27_s10, %s27_s10 }
  0x1c   :  { %p425_p10 = scmp.ne.s32.totalorder %s27_s10, %s424_s1  ;;  %p430_p12 = scmp.lt.s32.totalorder %s424_s1, %s424_s1 }
  0x1e   :  { %p431_p13 = por %p430_p12, %p429_p11 }
  0x20   :  { %p432_p0 = pnand %p431_p13, %p425_p10 }
  0x22   :  { %435 = shalt.err (!%p432_p0)
}
  0x23   :  { %32 = dma.hbm_to_vmem [thread:$0]  %s613_s0, 256, %s27_s10, [#allocation4], %s528_s26, %s528_s26, %s529_s27  }
  0x24   :  { %s444_s3 = scalar_lea.vmem %s59_s12, 256  ;;  %p449_p2 = scmp.lt.s32.totalorder %s59_s12, %s59_s12 }
  0x25   :  { %p445_p1 = scmp.ne.s32.totalorder %s59_s12, %s444_s3  ;;  %p450_p3 = scmp.lt.s32.totalorder %s444_s3, %s444_s3 }
  0x27   :  { %p451_p4 = por %p450_p3, %p449_p2 }
  0x29   :  { %p452_p5 = pnand %p451_p4, %p445_p1 }
  0x2b   :  { %455 = shalt.err (!%p452_p5)
}
  0x2c   :  { %64 = dma.hbm_to_vmem [thread:$0]  %s615_s2, 256, %s59_s12, [#allocation7], %s528_s26, %s528_s26, %s529_s27  }
  0x2d   :  { %s532_s17 = smov [#allocation11]  }
  0x2e   :  { %s90_s18 = sshll.u32 %s532_s17, 4  ;;  %s91_s18 = int_to_ptr.vmem [resolvable:$true] %s90_s18 }
  0x2f   :  { %s464_s19 = scalar_lea.vmem %s91_s18, 256  ;;  %p469_p7 = scmp.lt.s32.totalorder %s91_s18, %s91_s18 }
  0x30   :  { %p465_p6 = scmp.ne.s32.totalorder %s91_s18, %s464_s19  ;;  %p470_p8 = scmp.lt.s32.totalorder %s464_s19, %s464_s19 }
  0x32   :  { %p471_p9 = por %p470_p8, %p469_p7 }
  0x34   :  { %p472_p10 = pnand %p471_p9, %p465_p6 }
  0x36   :  { %475 = shalt.err (!%p472_p10)
}
  0x37   :  { %96 = dma.hbm_to_vmem [thread:$0]  %s617_s4, 256, %s91_s18, [#allocation10], %s528_s26, %s528_s26, %s529_s27  }
  0x38   :  { %516 = dma.done.wait [#allocation4], 256  }
  0x39   :  { %517 = vsyncadd [#allocation4], 4294967040 }
  0x3a   :  { %518 = dma.done.wait [#allocation7], 512  }
  0x3b   :  { %519 = vsyncadd [#allocation7], 4294966784 }
  0x3c   :  { %520 = dma.done.wait [#allocation10], 512  }
  0x3d   :  { %521 = vsyncadd [#allocation10], 4294966784  ;;  %v533_v0 = vmov 0.0   ;;  %v133_v1 = vld [vmem:[#allocation8 + $0xe] sm:$0x3]  ;;  %s534_s2 = smov [#allocation13]  }
  0x3e   :  { %127 = vst [vmem:[#allocation13 + $0xe] sm:$0x3] %v533_v0  ;;  %129 = vst [vmem:[#allocation12 + $0xe] sm:$0x3] %v533_v0  ;;  %v136_v2 = vld [vmem:[#allocation11 + $0xe] sm:$0x3] }
  0x3f   :  { %v134_v3 = vmul.f32 0.99, %v133_v1  ;;  %v131_v4 = vld [vmem:[#allocation3 + $0xe] sm:$0x3]  ;;  %v138_v5 = vld [vmem:[#allocation11 + $0xc] sm:$0x3] }
  0x40   :  { %v161_v6 = vld [vmem:[#allocation8 + $0xc] sm:$0x3]  ;;  %v143_v10 = vld [vmem:[#allocation6 + $0xc] sm:$0x3]  ;;  %v164_v15 = vld [vmem:[#allocation11 + $0xa] sm:$0x3] }
  0x41   :  { %v139_v7 = vmul.f32 %v136_v2, %v134_v3  ;;  %v145_v8 = vmul.f32 0.95, %v134_v3  ;;  %v162_v9 = vmul.f32 0.99, %v161_v6  ;;  %v159_v11 = vld [vmem:[#allocation3 + $0xc] sm:$0x3] }
  0x42   :  { %v187_v16 = vld [vmem:[#allocation8 + $0xa] sm:$0x3]  ;;  %vm144_vm0 = vcmp.eq.s32.totalorder %v143_v10, 2  ;;  %v213_v23 = vld [vmem:[#allocation8 + $0x8] sm:$0x3]  ;;  %s334_s4 = sshll.u32 %s534_s2, 4  ;;  %s335_s4 = int_to_ptr.vmem [resolvable:$true] %s334_s4 }
  0x43   :  { %v140_v12 = vadd.f32 %v139_v7, %v131_v4  ;;  %v146_v13 = vmul.f32 0.0, %v145_v8  ;;  %v165_v14 = vmul.f32 %v162_v9, %v138_v5  ;;  %v188_v17 = vmul.f32 0.99, %v187_v16  ;;  %v185_v22 = vld [vmem:[#allocation3 + $0xa] sm:$0x3]  ;;  %s535_s21 = smov [#allocation12]   ;;  %p481_p12 = scmp.lt.s32.totalorder %s335_s4, %s335_s4 }
  0x44   :  { %v171_v20 = vmul.f32 0.95, %v162_v9  ;;  %v169_v25 = vld [vmem:[#allocation6 + $0xa] sm:$0x3]  ;;  %v190_v26 = vld [vmem:[#allocation11 + $0x8] sm:$0x3] }
  0x45   :  { %v141_v18 = vsub.f32 %v140_v12, %v138_v5  ;;  %v166_v19 = vadd.f32 %v165_v14, %v159_v11  ;;  %v191_v21 = vmul.f32 %v188_v17, %v164_v15  ;;  %v214_v27 = vmul.f32 0.99, %v213_v23  ;;  %v239_v29 = vld [vmem:[#allocation8 + $0x6] sm:$0x3]  ;;  %v151_v31 = vld [vmem:[#allocation9 + $0xc] sm:$0x3] }
  0x46   :  { %vm170_vm1 = vcmp.eq.s32.totalorder %v169_v25, 2  ;;  %v197_v36 = vmul.f32 0.95, %v188_v17  ;;  %v211_v37 = vld [vmem:[#allocation3 + $0x8] sm:$0x3]  ;;  %s318_s22 = sshll.u32 %s535_s21, 4  ;;  %s319_s22 = int_to_ptr.vmem [resolvable:$true] %s318_s22 }
  0x47   :  { %v147_v24 = vadd.f32 %v146_v13, %v141_v18  ;;  %v167_v28 = vsub.f32 %v166_v19, %v164_v15  ;;  %v192_v32 = vadd.f32 %v191_v21, %v185_v22  ;;  %v217_v35 = vmul.f32 %v214_v27, %v190_v26  ;;  %v195_v41 = vld [vmem:[#allocation6 + $0x8] sm:$0x3]  ;;  %v216_v42 = vld [vmem:[#allocation11 + $0x6] sm:$0x3]  ;;  %v265_v44 = vld [vmem:[#allocation8 + $0x4] sm:$0x3] }
  0x48   :  { %v240_v38 = vmul.f32 0.99, %v239_v29  ;;  %v177_v47 = vld [vmem:[#allocation9 + $0xa] sm:$0x3]  ;;  %vm196_vm2 = vcmp.eq.s32.totalorder %v195_v41, 2  ;;  %s476_s23 = scalar_lea.vmem %s335_s4, 256 }
  0x49   :  { %v148_v30 = vsel %vm144_vm0, 0.0, %v147_v24  ;;  %v193_v43 = vsub.f32 %v192_v32, %v190_v26  ;;  %v218_v48 = vadd.f32 %v217_v35, %v211_v37  ;;  %v223_v52 = vmul.f32 0.95, %v214_v27  ;;  %v237_v53 = vld [vmem:[#allocation3 + $0x6] sm:$0x3]  ;;  %p477_p11 = scmp.ne.s32.totalorder %s335_s4, %s476_s23  ;;  %p482_p13 = scmp.lt.s32.totalorder %s476_s23, %s476_s23 }
  0x4a   :  { %v149_v33 = vadd.f32 %v148_v30, %v138_v5  ;;  %v172_v34 = vmul.f32 %v171_v20, %v148_v30  ;;  %v243_v51 = vmul.f32 %v240_v38, %v216_v42  ;;  %v266_v54 = vmul.f32 0.99, %v265_v44  ;;  %v221_v57 = vld [vmem:[#allocation6 + $0x6] sm:$0x3]  ;;  %v242_v58 = vld [vmem:[#allocation11 + $0x4] sm:$0x3] }
  0x4b   :  { %v219_v59 = vsub.f32 %v218_v48, %v216_v42  ;;  %v291_v60 = vld [vmem:[#allocation8 + $0x2] sm:$0x3]  ;;  %v203_v63 = vld [vmem:[#allocation9 + $0x8] sm:$0x3]  ;;  %vm222_vm3 = vcmp.eq.s32.totalorder %v221_v57, 2  ;;  %p483_p0 = por %p482_p13, %p481_p12 }
  0x4c   :  { %v152_v39 = vsub.f32 %v149_v33, %v151_v31  ;;  %v173_v40 = vadd.f32 %v172_v34, %v167_v28  ;;  %v244_v0 = vadd.f32 %v243_v51, %v237_v53  ;;  %v269_v3 = vmul.f32 %v266_v54, %v242_v58  ;;  %v263_v5 = vld [vmem:[#allocation3 + $0x4] sm:$0x3]  ;;  %v268_v9 = vld [vmem:[#allocation11 + $0x2] sm:$0x3]  ;;  %v247_v11 = vld [vmem:[#allocation6 + $0x4] sm:$0x3] }
  0x4d   :  { %v249_v4 = vmul.f32 0.95, %v240_v38  ;;  %v292_v6 = vmul.f32 0.99, %v291_v60  ;;  %v229_v14 = vld [vmem:[#allocation9 + $0x6] sm:$0x3]  ;;  %p484_p1 = pnand %p483_p0, %p477_p11 }
  0x4e   :  { %154 = vst [vmem:[#allocation13 + $0xc] sm:$0x3] %v152_v39  ;;  %v155_v45 = vmul.f32 %v152_v39, %v152_v39  ;;  %v174_v46 = vsel %vm170_vm1, 0.0, %v173_v40  ;;  %v245_v10 = vsub.f32 %v244_v0, %v242_v58  ;;  %vm248_vm4 = vcmp.eq.s32.totalorder %v247_v11, 2  ;;  %v289_v20 = vld [vmem:[#allocation3 + $0x2] sm:$0x3] }
  0x4f   :  { %v175_v49 = vadd.f32 %v174_v46, %v164_v15  ;;  %v198_v50 = vmul.f32 %v197_v36, %v174_v46  ;;  %v270_v15 = vadd.f32 %v269_v3, %v263_v5  ;;  %v294_v18 = vmul.f32 %v292_v6, %v268_v9  ;;  %v273_v24 = vld [vmem:[#allocation6 + $0x2] sm:$0x3]  ;;  %v255_v27 = vld [vmem:[#allocation9 + $0x4] sm:$0x3]  ;;  %v293_v31 = vld [vmem:[#allocation11] sm:$0x3] }
  0x50   :  { %157 = vst [vmem:[#allocation12 + $0xc] sm:$0x3] %v155_v45  ;;  %v275_v19 = vmul.f32 0.95, %v266_v54  ;;  %vm274_vm5 = vcmp.eq.s32.totalorder %v273_v24, 2 }
  0x51   :  { %v178_v55 = vsub.f32 %v175_v49, %v177_v47  ;;  %v199_v56 = vadd.f32 %v198_v50, %v193_v43  ;;  %v271_v23 = vsub.f32 %v270_v15, %v268_v9  ;;  %v295_v28 = vadd.f32 %v294_v18, %v289_v20  ;;  %v297_v36 = vld [vmem:[#allocation6] sm:$0x3]  ;;  %v281_v39 = vld [vmem:[#allocation9 + $0x2] sm:$0x3] }
  0x52   :  { %v299_v32 = vmul.f32 0.95, %v292_v6  ;;  %vm298_vm6 = vcmp.eq.s32.totalorder %v297_v36, 2  ;;  %v304_v46 = vld [vmem:[#allocation9] sm:$0x3] }
  0x53   :  { %180 = vst [vmem:[#allocation13 + $0xa] sm:$0x3] %v178_v55  ;;  %v181_v61 = vmul.f32 %v178_v55, %v178_v55  ;;  %v200_v62 = vsel %vm196_vm2, 0.0, %v199_v56  ;;  %v296_v35 = vsub.f32 %v295_v28, %v293_v31 }
  0x54   :  { %v201_v1 = vadd.f32 %v200_v62, %v190_v26  ;;  %v224_v2 = vmul.f32 %v223_v52, %v200_v62 }
  0x55   :  { %183 = vst [vmem:[#allocation12 + $0xa] sm:$0x3] %v181_v61 }
  0x56   :  { %v204_v7 = vsub.f32 %v201_v1, %v203_v63  ;;  %v225_v8 = vadd.f32 %v224_v2, %v219_v59 }
  0x58   :  { %206 = vst [vmem:[#allocation13 + $0x8] sm:$0x3] %v204_v7  ;;  %v207_v12 = vmul.f32 %v204_v7, %v204_v7  ;;  %v226_v13 = vsel %vm222_vm3, 0.0, %v225_v8 }
  0x59   :  { %v227_v16 = vadd.f32 %v226_v13, %v216_v42  ;;  %v250_v17 = vmul.f32 %v249_v4, %v226_v13 }
  0x5a   :  { %209 = vst [vmem:[#allocation12 + $0x8] sm:$0x3] %v207_v12 }
  0x5b   :  { %v230_v21 = vsub.f32 %v227_v16, %v229_v14  ;;  %v251_v22 = vadd.f32 %v250_v17, %v245_v10 }
  0x5d   :  { %232 = vst [vmem:[#allocation13 + $0x6] sm:$0x3] %v230_v21  ;;  %v233_v25 = vmul.f32 %v230_v21, %v230_v21  ;;  %v252_v26 = vsel %vm248_vm4, 0.0, %v251_v22 }
  0x5e   :  { %v253_v29 = vadd.f32 %v252_v26, %v242_v58  ;;  %v276_v30 = vmul.f32 %v275_v19, %v252_v26 }
  0x5f   :  { %235 = vst [vmem:[#allocation12 + $0x6] sm:$0x3] %v233_v25 }
  0x60   :  { %v256_v33 = vsub.f32 %v253_v29, %v255_v27  ;;  %v277_v34 = vadd.f32 %v276_v30, %v271_v23 }
  0x62   :  { %258 = vst [vmem:[#allocation13 + $0x4] sm:$0x3] %v256_v33  ;;  %v259_v37 = vmul.f32 %v256_v33, %v256_v33  ;;  %v278_v38 = vsel %vm274_vm5, 0.0, %v277_v34 }
  0x63   :  { %v279_v40 = vadd.f32 %v278_v38, %v268_v9  ;;  %v300_v41 = vmul.f32 %v299_v32, %v278_v38 }
  0x64   :  { %261 = vst [vmem:[#allocation12 + $0x4] sm:$0x3] %v259_v37 }
  0x65   :  { %v282_v42 = vsub.f32 %v279_v40, %v281_v39  ;;  %v301_v43 = vadd.f32 %v300_v41, %v296_v35 }
  0x67   :  { %284 = vst [vmem:[#allocation13 + $0x2] sm:$0x3] %v282_v42  ;;  %v285_v44 = vmul.f32 %v282_v42, %v282_v42  ;;  %v302_v45 = vsel %vm298_vm6, 0.0, %v301_v43 }
  0x68   :  { %v303_v47 = vadd.f32 %v302_v45, %v293_v31 }
  0x69   :  { %287 = vst [vmem:[#allocation12 + $0x2] sm:$0x3] %v285_v44 }
  0x6a   :  { %v305_v48 = vsub.f32 %v303_v47, %v304_v46 }
  0x6c   :  { %306 = vst [vmem:[#allocation13] sm:$0x3] %v305_v48  ;;  %v307_v49 = vmul.f32 %v305_v48, %v305_v48 }
  0x6d   :  { %487 = shalt.err (!%p484_p1)
}
  0x6e   :  { %340 = dma.vmem_to_hbm [thread:$0]  %s335_s4, 256, %s619_s6, [#allocation14], %s528_s26, %s528_s26, %s529_s27   ;;  %308 = vst [vmem:[#allocation12] sm:$0x3] %v307_v49 }
  0x6f   :  { %s496_s28 = scalar_lea.vmem %s319_s22, 256  ;;  %p501_p3 = scmp.lt.s32.totalorder %s319_s22, %s319_s22 }
  0x70   :  { %p497_p2 = scmp.ne.s32.totalorder %s319_s22, %s496_s28  ;;  %p502_p4 = scmp.lt.s32.totalorder %s496_s28, %s496_s28 }
  0x72   :  { %p503_p5 = por %p502_p4, %p501_p3 }
  0x74   :  { %p504_p6 = pnand %p503_p5, %p497_p2 }
  0x76   :  { %507 = shalt.err (!%p504_p6)
}
  0x77   :  { %324 = dma.vmem_to_hbm [thread:$0]  %s319_s22, 256, %s618_s5, [#allocation5], %s528_s26, %s528_s26, %s529_s27  }
  0x78   :  { %522 = dma.done.wait [#allocation5], 256  }
  0x79   :  { %523 = vsyncadd [#allocation5], 4294967040 }
  0x7a   :  { %524 = dma.done.wait [#allocation14], 256  }
  0x7b   :  { %525 = vsyncadd [#allocation14], 4294967040 }
  0x7c   :  { %347 = vsyncpa [#allocation4], 1 }
  0x7d   :  { %348 = vsyncpa [#allocation7], 1 }
  0x7e   :  { %349 = vsyncpa [#allocation10], 1 }
  0x7f   :  { %350 = vsyncpa [#allocation5], 1 }
  0x80   :  { %351 = vsyncpa [#allocation14], 1 }

</bundles_post_ra>
